<compile_context>
chip_gen: v6e
topology: v6e:2x2x1
jax: 0.10.0
libtpu: 0.0.40
codegen_flags: <defaults>
</compile_context>

<pallas_src>
import jax
import jax.numpy as jnp
from jax.experimental import pallas as pl
from jax.experimental.pallas import tpu as pltpu

_LANE = 128
_SUBLANE = 8


def _ceil_div(a, b):
    return -(-a // b)


def _make_dice_kernel(*, block_rows, blocks_per_split, total_rows, needs_mask):
    def kernel(x_ref, t_ref, o_ref):
        c = pl.program_id(0)   # megacore split ("parallel")
        i = pl.program_id(1)   # reduction steps within the split ("arbitrary")

        @pl.when(i == 0)
        def _init():
            o_ref[...] = jnp.zeros_like(o_ref)

        x = x_ref[...].astype(jnp.float32)
        t = t_ref[...].astype(jnp.float32)

        if needs_mask:
            # Partial last block / clamped duplicate block: zero rows that lie
            # beyond the logical (total_rows, 128) array.
            row_start = (c * blocks_per_split + i) * block_rows
            row_ids = row_start + jax.lax.broadcasted_iota(jnp.int32, x.shape, 0)
            valid = row_ids < total_rows
            x = jnp.where(valid, x, 0.0)
            t = jnp.where(valid, t, 0.0)

        # (block_rows, 128) -> (block_rows//8, 8, 128) is a free regrouping of
        # sublane tiles; the axis-0 reduction is pure VPU vreg adds (no XLU,
        # no per-step cross-lane reduce, no scalar RMW dependency).
        xr = x.reshape(block_rows // _SUBLANE, _SUBLANE, _LANE)
        tr = t.reshape(block_rows // _SUBLANE, _SUBLANE, _LANE)

        o_ref[0, 0] += jnp.sum(xr * tr, axis=0)   # intersection partials
        o_ref[0, 1] += jnp.sum(xr, axis=0)        # sum(input) partials
        o_ref[0, 2] += jnp.sum(tr, axis=0)        # sum(target) partials

    return kernel


def dice_loss(inp, target, *, block_rows=2048):
    """Pallas implementation of DiceLoss.forward(input, target)."""
    chunk = _SUBLANE * _LANE  # 1024: minimum granularity for a clean 2-D view

    xf = inp.reshape(-1)
    tf = target.reshape(-1)
    n = xf.shape[0]
    assert tf.shape[0] == n, "input and target must have the same #elements"

    # Pad only when the flat length is not a multiple of 8*128.  Zero padding
    # is exact for all three sums.  (Typical NCHW activations need no pad, so
    # no extra HBM pass happens in the wrapper.)
    padded = _ceil_div(n, chunk) * chunk
    if padded != n:
        xf = jnp.pad(xf, (0, padded - n))
        tf = jnp.pad(tf, (0, padded - n))

    rows = padded // _LANE                     # multiple of 8
    x2 = xf.reshape(rows, _LANE)               # free row-major reshape
    t2 = tf.reshape(rows, _LANE)

    br = min(block_rows, rows)                 # both multiples of 8
    total_blocks = _ceil_div(rows, br)
    n_splits = 2 if total_blocks >= 2 else 1   # per-TensorCore split (v7x)
    bpc = _ceil_div(total_blocks, n_splits)    # blocks per split
    needs_mask = (n_splits * bpc * br) != rows

    def in_map(c, i):
        # Clamp so the DMA never targets a block past the array; the kernel
        # masks the (duplicate) contribution of clamped blocks to zero.
        return (jnp.minimum(c * bpc + i, total_blocks - 1), 0)

    kernel = _make_dice_kernel(
        block_rows=br, blocks_per_split=bpc, total_rows=rows,
        needs_mask=needs_mask)

    partials = pl.pallas_call(
        kernel,
        out_shape=jax.ShapeDtypeStruct((n_splits, 3, _SUBLANE, _LANE),
                                       jnp.float32),
        grid_spec=pltpu.PrefetchScalarGridSpec(
            num_scalar_prefetch=0,
            grid=(n_splits, bpc),
            in_specs=[
                pl.BlockSpec((br, _LANE), in_map),
                pl.BlockSpec((br, _LANE), in_map),
            ],
            out_specs=pl.BlockSpec((1, 3, _SUBLANE, _LANE),
                                   lambda c, i: (c, 0, 0, 0)),
        ),
        compiler_params=pltpu.CompilerParams(
            dimension_semantics=("parallel", "arbitrary"),
        ),
    )(x2, t2)

    # Tiny cross-lane / cross-core reduction + dice formula in plain JAX.
    sums = jnp.sum(partials, axis=(0, 2, 3))   # [sum(x*t), sum(x), sum(t)]
    smooth = 1.0
    return 1.0 - (2.0 * sums[0] + smooth) / (sums[1] + sums[2] + smooth)


def dice_loss_ref(inp, target):
    """Pure-JAX reference matching the PyTorch module."""
    smooth = 1.0
    xf = inp.reshape(-1).astype(jnp.float32)
    tf = target.reshape(-1).astype(jnp.float32)
    intersection = jnp.sum(xf * tf)
    return 1.0 - (2.0 * intersection + smooth) / (jnp.sum(xf) + jnp.sum(tf) + smooth)


if __name__ == "__main__":
    key = jax.random.PRNGKey(0)
    kx, kt = jax.random.split(key)

    # NCHW-style shapes, as produced by a segmentation head (sigmoid probs)
    # and a binary mask target.
    x = jax.nn.sigmoid(jax.random.normal(kx, (2, 4, 16, 16), dtype=jnp.float32))
    t = (jax.random.uniform(kt, (2, 4, 16, 16)) > 0.5).astype(jnp.float32)

    loss = jax.block_until_ready(dice_loss(x, t))
    ref = jax.block_until_ready(dice_loss_ref(x, t))
    assert jnp.allclose(loss, ref, rtol=1e-5, atol=1e-6), (loss, ref)

    # Secondary check: ragged size + multi-block grid + megacore split path
    # (small block_rows forces several partial / clamped blocks).
    x2 = jax.nn.sigmoid(jax.random.normal(kx, (2, 4, 16, 20), dtype=jnp.float32))
    t2 = (jax.random.uniform(kt, (2, 4, 16, 20)) > 0.5).astype(jnp.float32)
    loss2 = jax.block_until_ready(dice_loss(x2, t2, block_rows=8))
    ref2 = jax.block_until_ready(dice_loss_ref(x2, t2))
    assert jnp.allclose(loss2, ref2, rtol=1e-5, atol=1e-6), (loss2, ref2)

    print("KERNEL_OK")
</pallas_src>

<mosaic_0001>
module attributes {stable_mosaic.version = 11 : i64} {
  func.func @kernel(%arg0: i32, %arg1: i32, %arg2: memref<16x128xf32, #tpu.memory_space<vmem>>, %arg3: memref<16x128xf32, #tpu.memory_space<vmem>>, %arg4: memref<1x3x8x128xf32, #tpu.memory_space<vmem>>) attributes {dimension_semantics = [#tpu.dimension_semantics<parallel>, #tpu.dimension_semantics<arbitrary>], iteration_bounds = array<i64: 1, 1>, scalar_prefetch = 0 : i64, scratch_operands = 0 : i64, tpu.core_type = #tpu.core_type<tc>, window_params = [{transform_indices = @transform_0, window_bounds = array<i64: 16, 128>}, {transform_indices = @transform_1, window_bounds = array<i64: 16, 128>}, {transform_indices = @transform_2, window_bounds = array<i64: 1, 3, 8, 128>}]} {
    %c0_i32 = arith.constant 0 : i32
    %0 = arith.cmpi eq, %arg1, %c0_i32 : i32
    %1 = arith.extui %0 : i1 to i32
    %c0_i32_0 = arith.constant 0 : i32
    %2 = arith.cmpi ne, %1, %c0_i32_0 : i32
    scf.if %2 {
      %cst_28 = arith.constant 0.000000e+00 : f32
      %29 = vector.broadcast %cst_28 : f32 to vector<1x3x8x128xf32>
      %c0_29 = arith.constant 0 : index
      %c0_30 = arith.constant 0 : index
      %c0_31 = arith.constant 0 : index
      %c0_32 = arith.constant 0 : index
      %30 = vector.load %arg4[%c0_29, %c0_30, %c0_31, %c0_32] : memref<1x3x8x128xf32, #tpu.memory_space<vmem>>, vector<1x3x8x128xf32>
      tpu.vector_store %arg4[%c0_29, %c0_30, %c0_31, %c0_32], %29 {strides = array<i32>} : memref<1x3x8x128xf32, #tpu.memory_space<vmem>>, vector<1x3x8x128xf32>,
    } else {
    }
    %c0 = arith.constant 0 : index
    %c0_1 = arith.constant 0 : index
    %3 = vector.load %arg2[%c0, %c0_1] : memref<16x128xf32, #tpu.memory_space<vmem>>, vector<16x128xf32>
    %c0_2 = arith.constant 0 : index
    %c0_3 = arith.constant 0 : index
    %4 = vector.load %arg3[%c0_2, %c0_3] : memref<16x128xf32, #tpu.memory_space<vmem>>, vector<16x128xf32>
    %5 = vector.shape_cast %3 : vector<16x128xf32> to vector<2x8x128xf32>
    %6 = vector.shape_cast %4 : vector<16x128xf32> to vector<2x8x128xf32>
    %c0_4 = arith.constant 0 : index
    %c0_5 = arith.constant 0 : index
    %c0_6 = arith.constant 0 : index
    %c0_7 = arith.constant 0 : index
    %7 = vector.load %arg4[%c0_4, %c0_5, %c0_6, %c0_7] : memref<1x3x8x128xf32, #tpu.memory_space<vmem>>, vector<1x1x8x128xf32>
    %8 = vector.shape_cast %7 : vector<1x1x8x128xf32> to vector<8x128xf32>
    %9 = arith.mulf %5, %6 : vector<2x8x128xf32>
    %cst = arith.constant dense<0.000000e+00> : vector<8x128xf32>
    %10 = vector.multi_reduction <add>, %9, %cst [0] : vector<2x8x128xf32> to vector<8x128xf32>
    %11 = arith.addf %8, %10 : vector<8x128xf32>
    %c0_8 = arith.constant 0 : index
    %c0_9 = arith.constant 0 : index
    %c0_10 = arith.constant 0 : index
    %c0_11 = arith.constant 0 : index
    %12 = vector.load %arg4[%c0_8, %c0_9, %c0_10, %c0_11] : memref<1x3x8x128xf32, #tpu.memory_space<vmem>>, vector<1x1x8x128xf32>
    %13 = vector.shape_cast %12 : vector<1x1x8x128xf32> to vector<8x128xf32>
    %14 = vector.shape_cast %11 : vector<8x128xf32> to vector<1x1x8x128xf32>
    tpu.vector_store %arg4[%c0_8, %c0_9, %c0_10, %c0_11], %14 {strides = array<i32>} : memref<1x3x8x128xf32, #tpu.memory_space<vmem>>, vector<1x1x8x128xf32>,
    %c0_12 = arith.constant 0 : index
    %c1 = arith.constant 1 : index
    %c0_13 = arith.constant 0 : index
    %c0_14 = arith.constant 0 : index
    %15 = vector.load %arg4[%c0_12, %c1, %c0_13, %c0_14] : memref<1x3x8x128xf32, #tpu.memory_space<vmem>>, vector<1x1x8x128xf32>
    %16 = vector.shape_cast %15 : vector<1x1x8x128xf32> to vector<8x128xf32>
    %cst_15 = arith.constant dense<0.000000e+00> : vector<8x128xf32>
    %17 = vector.multi_reduction <add>, %5, %cst_15 [0] : vector<2x8x128xf32> to vector<8x128xf32>
    %18 = arith.addf %16, %17 : vector<8x128xf32>
    %c0_16 = arith.constant 0 : index
    %c1_17 = arith.constant 1 : index
    %c0_18 = arith.constant 0 : index
    %c0_19 = arith.constant 0 : index
    %19 = vector.load %arg4[%c0_16, %c1_17, %c0_18, %c0_19] : memref<1x3x8x128xf32, #tpu.memory_space<vmem>>, vector<1x1x8x128xf32>
    %20 = vector.shape_cast %19 : vector<1x1x8x128xf32> to vector<8x128xf32>
    %21 = vector.shape_cast %18 : vector<8x128xf32> to vector<1x1x8x128xf32>
    tpu.vector_store %arg4[%c0_16, %c1_17, %c0_18, %c0_19], %21 {strides = array<i32>} : memref<1x3x8x128xf32, #tpu.memory_space<vmem>>, vector<1x1x8x128xf32>,
    %c0_20 = arith.constant 0 : index
    %c2 = arith.constant 2 : index
    %c0_21 = arith.constant 0 : index
    %c0_22 = arith.constant 0 : index
    %22 = vector.load %arg4[%c0_20, %c2, %c0_21, %c0_22] : memref<1x3x8x128xf32, #tpu.memory_space<vmem>>, vector<1x1x8x128xf32>
    %23 = vector.shape_cast %22 : vector<1x1x8x128xf32> to vector<8x128xf32>
    %cst_23 = arith.constant dense<0.000000e+00> : vector<8x128xf32>
    %24 = vector.multi_reduction <add>, %6, %cst_23 [0] : vector<2x8x128xf32> to vector<8x128xf32>
    %25 = arith.addf %23, %24 : vector<8x128xf32>
    %c0_24 = arith.constant 0 : index
    %c2_25 = arith.constant 2 : index
    %c0_26 = arith.constant 0 : index
    %c0_27 = arith.constant 0 : index
    %26 = vector.load %arg4[%c0_24, %c2_25, %c0_26, %c0_27] : memref<1x3x8x128xf32, #tpu.memory_space<vmem>>, vector<1x1x8x128xf32>
    %27 = vector.shape_cast %26 : vector<1x1x8x128xf32> to vector<8x128xf32>
    %28 = vector.shape_cast %25 : vector<8x128xf32> to vector<1x1x8x128xf32>
    tpu.vector_store %arg4[%c0_24, %c2_25, %c0_26, %c0_27], %28 {strides = array<i32>} : memref<1x3x8x128xf32, #tpu.memory_space<vmem>>, vector<1x1x8x128xf32>,
    return
  }
  func.func @transform_0(%arg0: i32, %arg1: i32) -> (i32, i32) {
    %c1_i32 = arith.constant 1 : i32
    %0 = arith.muli %arg0, %c1_i32 : i32
    %1 = arith.addi %0, %arg1 : i32
    %c0_i32 = arith.constant 0 : i32
    %2 = arith.minsi %1, %c0_i32 : i32
    %c0_i32_0 = arith.constant 0 : i32
    %c0_i32_1 = arith.constant 0 : i32
    return %2, %c0_i32_0 : i32, i32
  }
  func.func @transform_1(%arg0: i32, %arg1: i32) -> (i32, i32) {
    %c1_i32 = arith.constant 1 : i32
    %0 = arith.muli %arg0, %c1_i32 : i32
    %1 = arith.addi %0, %arg1 : i32
    %c0_i32 = arith.constant 0 : i32
    %2 = arith.minsi %1, %c0_i32 : i32
    %c0_i32_0 = arith.constant 0 : i32
    %c0_i32_1 = arith.constant 0 : i32
    return %2, %c0_i32_0 : i32, i32
  }
  func.func @transform_2(%arg0: i32, %arg1: i32) -> (i32, i32, i32, i32) {
    %c0_i32 = arith.constant 0 : i32
    %c0_i32_0 = arith.constant 0 : i32
    %c0_i32_1 = arith.constant 0 : i32
    %c0_i32_2 = arith.constant 0 : i32
    return %arg0, %c0_i32, %c0_i32_0, %c0_i32_1 : i32, i32, i32, i32
  }
}

</mosaic_0001>

<bundles_post_ra>
// kernel: tpu_custom_call.1
= control target key start
LH: loop header
LB: loop body
LE: loop exit
PB: predicated region body
PF: predicated region fallthrough
CT: control target
= control target key end

     0   :  { %7 = vsyncpa [#allocation3], 0  ;;  %s219_s0 = inlined_call_operand.hbm [shape: f32[16,128], index: 0, kind: input, shape index: {}]   ;;  %s220_s1 = inlined_call_operand.hbm [shape: f32[16,128], index: 1, kind: input, shape index: {}]   ;;  %s221_s2 = inlined_call_operand.hbm [shape: f32[1,3,8,128], index: 2, kind: output, shape index: {}]  }
   0x1   :  { %8 = vsyncpa [#allocation6], 0 }
   0x2   :  { %9 = vsyncpa [#allocation4], 0  ;;  %s181_s9 = smov [#allocation2]  }
   0x3   :  { %s21_s10 = sshll.u32 %s181_s9, 4  ;;  %s22_s10 = int_to_ptr.vmem [resolvable:$true] %s21_s10 }
   0x4   :  { %s123_s11 = scalar_lea.vmem %s22_s10, 256  ;;  %p128_p1 = scmp.lt.s32.totalorder %s22_s10, %s22_s10 }
   0x5   :  { %p124_p0 = scmp.ne.s32.totalorder %s22_s10, %s123_s11  ;;  %p129_p2 = scmp.lt.s32.totalorder %s123_s11, %s123_s11 }
   0x7   :  { %p130_p3 = por %p129_p2, %p128_p1 }
   0x9   :  { %p131_p4 = pnand %p130_p3, %p124_p0 }
   0xb   :  { %134 = shalt.err (!%p131_p4)
}
   0xc   :  { %s182_s12 = smov 128   ;;  %s183_s13 = smov 8  }
   0xd   :  { %27 = dma.hbm_to_vmem [thread:$0]  %s219_s0, 256, %s22_s10, [#allocation3], %s182_s12, %s182_s12, %s183_s13  }
   0xe   :  { %s184_s16 = smov [#allocation5]  }
   0xf   :  { %s39_s17 = sshll.u32 %s184_s16, 4  ;;  %s40_s17 = int_to_ptr.vmem [resolvable:$true] %s39_s17 }
  0x10   :  { %s143_s18 = scalar_lea.vmem %s40_s17, 256  ;;  %p148_p6 = scmp.lt.s32.totalorder %s40_s17, %s40_s17 }
  0x11   :  { %p144_p5 = scmp.ne.s32.totalorder %s40_s17, %s143_s18  ;;  %p149_p7 = scmp.lt.s32.totalorder %s143_s18, %s143_s18 }
  0x13   :  { %p150_p8 = por %p149_p7, %p148_p6 }
  0x15   :  { %p151_p9 = pnand %p150_p8, %p144_p5 }
  0x17   :  { %154 = shalt.err (!%p151_p9)
}
  0x18   :  { %45 = dma.hbm_to_vmem [thread:$0]  %s220_s1, 256, %s40_s17, [#allocation6], %s182_s12, %s182_s12, %s183_s13  }
  0x19   :  { %175 = dma.done.wait [#allocation3], 256  }
  0x1a   :  { %176 = vsyncadd [#allocation3], 4294967040 }
  0x1b   :  { %177 = dma.done.wait [#allocation6], 256  }
  0x1c   :  { %178 = vsyncadd [#allocation6], 4294967040  ;;  %v67_v0 = vld [vmem:[#allocation2] sm:$0xff]  ;;  %v68_v1 = vld [vmem:[#allocation2 + $0x8] sm:$0xff]  ;;  %s185_s0 = smov [#allocation7]  }
  0x1d   :  { %v69_v2 = vld [vmem:[#allocation5] sm:$0xff]  ;;  %v70_v3 = vld [vmem:[#allocation5 + $0x8] sm:$0xff]  ;;  %v79_v5 = vadd.f32 %v68_v1, %v67_v0  ;;  %s92_s21 = sshll.u32 %s185_s0, 4  ;;  %s93_s21 = int_to_ptr.vmem [resolvable:$true] %s92_s21 }
  0x1e   :  { %v72_v4 = vmul.f32 %v69_v2, %v67_v0  ;;  %v73_v6 = vmul.f32 %v70_v3, %v68_v1  ;;  %v84_v7 = vadd.f32 %v70_v3, %v69_v2  ;;  %s155_s1 = scalar_lea.vmem %s93_s21, 384  ;;  %p160_p11 = scmp.lt.s32.totalorder %s93_s21, %s93_s21 }
  0x1f   :  { %81 = vst [vmem:[#allocation7 + $0x8] sm:$0xff] %v79_v5  ;;  %p156_p10 = scmp.ne.s32.totalorder %s93_s21, %s155_s1  ;;  %p161_p12 = scmp.lt.s32.totalorder %s155_s1, %s155_s1 }
  0x20   :  { %v74_v8 = vadd.f32 %v73_v6, %v72_v4  ;;  %86 = vst [vmem:[#allocation7 + $0x10] sm:$0xff] %v84_v7 }
  0x21   :  { %p162_p13 = por %p161_p12, %p160_p11 }
  0x22   :  { %76 = vst [vmem:[#allocation7] sm:$0xff] %v74_v8 }
  0x23   :  { %p163_p0 = pnand %p162_p13, %p156_p10 }
  0x25   :  { %166 = shalt.err (!%p163_p0)
}
  0x26   :  { %98 = dma.vmem_to_hbm [thread:$0]  %s93_s21, 384, %s221_s2, [#allocation4], %s182_s12, %s182_s12, %s183_s13  }
  0x27   :  { %179 = dma.done.wait [#allocation4], 384  }
  0x28   :  { %180 = vsyncadd [#allocation4], 4294966912 }
  0x29   :  { %102 = vsyncpa [#allocation3], 1 }
  0x2a   :  { %103 = vsyncpa [#allocation6], 1 }
  0x2b   :  { %104 = vsyncpa [#allocation4], 1 }

</bundles_post_ra>
